<compile_context>
chip_gen: v5e
topology: v5e:2x2
jax: 0.10.0
libtpu: 0.0.40
codegen_flags: <defaults>
</compile_context>

<pallas_src>
import math

import jax
import jax.numpy as jnp
from jax.experimental import pallas as pl
from jax.experimental.pallas import tpu as pltpu

MIN_VALUE = -1.0
MAX_VALUE = 1.0
SCALE = 255.0 / (MAX_VALUE - MIN_VALUE)          # 127.5
OFFSET = 0.5 - MIN_VALUE * SCALE                 # 128.0  (single fused mul-add)

_LANE = 128
_SUBLANE = 8
_ALIGN = _SUBLANE * _LANE                        # 1024 elements
_MAX_BLOCK_ROWS = 4096                           # 2 MiB/block; ~8 MiB double-buffered


def _postproc_kernel(x_ref, o_ref):
    # In-kernel cast (free under the DMA); single mul-add + clamp on the VPU.
    x = x_ref[...].astype(jnp.float32)
    o_ref[...] = jnp.clip(x * SCALE + OFFSET, 0.0, 255.0)


def _round_up(n, m):
    return ((n + m - 1) // m) * m


def post_synthesis_processing(image):
    """Applies PostSynthesisProcessing.forward. Any shape / numeric dtype -> float32."""
    shape = image.shape
    total = math.prod(shape)

    # Flatten and pad to a multiple of 8*128 so the slab is (rows, 128) with rows % 8 == 0.
    padded_total = _round_up(total, _ALIGN)
    x_flat = image.reshape(total)
    if padded_total != total:
        x_flat = jnp.pad(x_flat, (0, padded_total - total))
    rows = padded_total // _LANE
    x2 = x_flat.reshape(rows, _LANE)

    # Block rows: multiple of 8, capped for VMEM, and >= 2 grid steps when possible so
    # the parallel axis can shard across v7x's two TensorCores.
    block_rows = min(_MAX_BLOCK_ROWS, _round_up(pl.cdiv(rows, 2), _SUBLANE))
    block_rows = max(_SUBLANE, min(block_rows, rows))
    grid = (pl.cdiv(rows, block_rows),)

    out = pl.pallas_call(
        _postproc_kernel,
        out_shape=jax.ShapeDtypeStruct((rows, _LANE), jnp.float32),
        grid=grid,
        in_specs=[pl.BlockSpec((block_rows, _LANE), lambda i: (i, 0))],
        out_specs=pl.BlockSpec((block_rows, _LANE), lambda i: (i, 0)),
        compiler_params=pltpu.CompilerParams(dimension_semantics=("parallel",)),
    )(x2)

    out_flat = out.reshape(padded_total)
    if padded_total != total:
        out_flat = out_flat[:total]
    return out_flat.reshape(shape)


def _reference(image):
    x = image.astype(jnp.float32)
    y = (x - MIN_VALUE) * (255.0 / (MAX_VALUE - MIN_VALUE)) + 0.5
    return jnp.clip(y, 0.0, 255.0)


if __name__ == "__main__":
    key = jax.random.PRNGKey(0)
    k1, k2 = jax.random.split(key)

    # Case 1: already 1024-aligned element count (2*4*16*16 = 2048).
    x1 = jax.random.uniform(k1, (2, 4, 16, 16), jnp.float32, minval=-1.5, maxval=1.5)
    y1 = jax.block_until_ready(post_synthesis_processing(x1))

    # Case 2: odd element count (2*3*15*17 = 1530) -> pad / slice path.
    x2 = jax.random.uniform(k2, (2, 3, 15, 17), jnp.float32, minval=-1.5, maxval=1.5)
    y2 = jax.block_until_ready(post_synthesis_processing(x2))

    ok = (
        y1.shape == x1.shape
        and y2.shape == x2.shape
        and y1.dtype == jnp.float32
        and y2.dtype == jnp.float32
        and jnp.allclose(y1, _reference(x1), atol=1e-4, rtol=1e-5)
        and jnp.allclose(y2, _reference(x2), atol=1e-4, rtol=1e-5)
    )
    if bool(ok):
        print("KERNEL_OK")
    else:
        raise SystemExit("mismatch vs reference")
</pallas_src>

<mosaic_0001>
module attributes {stable_mosaic.version = 11 : i64} {
  func.func @_postproc_kernel(%arg0: i32, %arg1: memref<8x128xf32, #tpu.memory_space<vmem>>, %arg2: memref<8x128xf32, #tpu.memory_space<vmem>>) attributes {dimension_semantics = [#tpu.dimension_semantics<parallel>], iteration_bounds = array<i64: 2>, scalar_prefetch = 0 : i64, scratch_operands = 0 : i64, tpu.core_type = #tpu.core_type<tc>, window_params = [{transform_indices = @transform_0, window_bounds = array<i64: 8, 128>}, {transform_indices = @transform_1, window_bounds = array<i64: 8, 128>}]} {
    %c0 = arith.constant 0 : index
    %c0_0 = arith.constant 0 : index
    %0 = vector.load %arg1[%c0, %c0_0] : memref<8x128xf32, #tpu.memory_space<vmem>>, vector<8x128xf32>
    %cst = arith.constant 1.275000e+02 : f32
    %1 = vector.broadcast %cst : f32 to vector<8x128xf32>
    %2 = arith.mulf %0, %1 : vector<8x128xf32>
    %cst_1 = arith.constant 1.280000e+02 : f32
    %3 = vector.broadcast %cst_1 : f32 to vector<8x128xf32>
    %4 = arith.addf %2, %3 : vector<8x128xf32>
    %cst_2 = arith.constant 0.000000e+00 : f32
    %cst_3 = arith.constant 2.550000e+02 : f32
    %5 = vector.broadcast %cst_2 : f32 to vector<8x128xf32>
    %6 = arith.maximumf %5, %4 : vector<8x128xf32>
    %7 = vector.broadcast %cst_3 : f32 to vector<8x128xf32>
    %8 = arith.minimumf %7, %6 : vector<8x128xf32>
    %c0_4 = arith.constant 0 : index
    %c0_5 = arith.constant 0 : index
    %9 = vector.load %arg2[%c0_4, %c0_5] : memref<8x128xf32, #tpu.memory_space<vmem>>, vector<8x128xf32>
    tpu.vector_store %arg2[%c0_4, %c0_5], %8 {strides = array<i32>} : memref<8x128xf32, #tpu.memory_space<vmem>>, vector<8x128xf32>,
    return
  }
  func.func @transform_0(%arg0: i32) -> (i32, i32) {
    %c0_i32 = arith.constant 0 : i32
    %c0_i32_0 = arith.constant 0 : i32
    return %arg0, %c0_i32 : i32, i32
  }
  func.func @transform_1(%arg0: i32) -> (i32, i32) {
    %c0_i32 = arith.constant 0 : i32
    %c0_i32_0 = arith.constant 0 : i32
    return %arg0, %c0_i32 : i32, i32
  }
}

</mosaic_0001>

<bundles_post_ra>
// kernel: tpu_custom_call.1
= control target key start
LH: loop header
LB: loop body
LE: loop exit
PB: predicated region body
PF: predicated region fallthrough
CT: control target
= control target key end

     0   :  { %6 = vsyncpa [#allocation3], 0  ;;  %s519_s0 = inlined_call_operand.hbm [shape: f32[16,128], index: 0, kind: input, shape index: {}]   ;;  %s520_s1 = inlined_call_operand.hbm [shape: f32[16,128], index: 1, kind: output, shape index: {}]  }
   0x1   :  { %8 = vsyncpa [#allocation3 + $0x1], 0 }
   0x2   :  { %9 = vsyncpa [#allocation4], 0 }
   0x3   :  { %11 = vsyncpa [#allocation4 + $0x1], 0  ;;  %s392_s6 = smov 0   ;;  %s394_s7 = smov 0  }
   0x4   :  { %s396_s8 = smov 0   ;;  %s398_s9 = smov 0  }
   0x5 LB: > { %s413_s10 = sadd.s32 4294967295, %s380_s9   ;;  %s226_s11 = sadd.s32 4294967294, %s380_s9   ;;  %s380_s9 = sphi %s398_s9, %s530_s9   ;;  %s376_s8 = sphi %s396_s8, %s529_s8   ;;  %s372_s7 = sphi %s394_s7, %s528_s7   ;;  %s368_s6 = sphi %s392_s6, %s527_s6  }
   0x6   : > { %s417_s12 = sadd.s32 1, %s380_s9   ;;  %s24_s13 = sadd.s32 1, %s376_s8 }
   0x7   : > { %s21_s14 = ssub.s32 %s380_s9, %s417_s12  ;;  %p31_p0 = scmp.ne.s32.totalorder %s376_s8, %s372_s7 }
   0x8   : > { %p22_p1 = scmp.eq.s32.totalorder %s21_s14, 0  ;;  %p32_p2 = scmp.eq.s32.totalorder %s380_s9, 0 }
   0x9   : > { %p37_p3 = scmp.ne.s32.totalorder %s372_s7, %s368_s6  ;;  %p38_p4 = scmp.eq.s32.totalorder %s413_s10, 0 }
   0xa   : > { %s429_s15 = scalar_select %p22_p1, %s376_s8, %s24_s13  }
   0xb   : > { %p431_p5 = por %p32_p2, %p31_p0  ;;  %p435_p6 = por %p38_p4, %p37_p3 }
   0xc   : > { %p61_p7 = scmp.eq.s32.totalorder %s413_s10, 1  ;;  %p67_p8 = scmp.eq.s32.totalorder %s226_s11, 1 }
   0xd   : > { %p250_p10 = scmp.lt.s32.totalorder %s380_s9, 2  ;;  %s87_s20 = sand.u32 1, %s376_s8  }
   0xe   : > { %p442_p11 = por %p61_p7, %p31_p0  ;;  %p446_p12 = por %p67_p8, %p37_p3 }
   0xf   : > { %s230_s21 = sshll.u32 %s380_s9, 3  ;;  %s229_s22 = sshll.u32 %s87_s20, 3 }
  0x10   : > { %s95_s25 = scalar_lea.hbm %s519_s0, %s230_s21  ;;  %s91_s27 = scalar_lea.vmem [#allocation2], %s229_s22 }
  0x11   : > { %s97_s26 = sshll.u32 %s95_s25, 4  ;;  %s99_s28 = sshll.u32 %s91_s27, 4  ;;  %s98_s26 = int_to_ptr.hbm [resolvable:$true] %s97_s26  ;;  %s100_s28 = int_to_ptr.vmem [resolvable:$true] %s99_s28 }
  0x12   : > { %p457_p13 = pnand %p250_p10, %p431_p5  ;;  %p231_p0 = scmp.ge.s32.totalorder %s380_s9, 1 }
  0x13   : > { %p104_p1 = scmp.lt.s32.totalorder %s380_s9, 3  ;;  %s88_s30 = scalar_lea.sflag [#allocation3], %s87_s20 }
  0x14   : > { %s284_s2 = sshra.s32 %s98_s26, 4  ;;  %p288_p3 = pneg %p457_p13  ;;  %s285_s2 = int_to_ptr.hbm [resolvable:$true] %s284_s2 }
  0x15   : > { %s286_s3 = scalar_lea.hbm %s285_s2, 8  ;;  %s291_s11 = scalar_lea.hbm %s519_s0, 16 }
  0x16   : > { %p287_p2 = scmp.ne.s32.totalorder %s285_s2, %s286_s3  ;;  %p292_p5 = scmp.lt.s32.totalorder %s285_s2, %s519_s0 }
  0x17   : > { %p293_p8 = scmp.lt.s32.totalorder %s291_s11, %s286_s3 }
  0x18   : > { %p289_p4 = pnand %p288_p3, %p287_p2 }
  0x19   : > { %p294_p10 = por %p293_p8, %p292_p5 }
  0x1a   : > { %p290_p7 = pneg %p289_p4 }
  0x1c   : > { %p295_p9 = pnand %p294_p10, %p290_p7 }
  0x1e   : > { %298 = shalt.err (!%p295_p9)
}
  0x1f   : > { %245 = dma.hbm_to_vmem [thread:$0]  (!%p457_p13), %s98_s26, 128, %s100_s28, %s88_s30  }
  0x20   : > { %p105_p2 = pnand %p231_p0, %p104_p1 }
  0x21   : > { %s478_s16 = sand.u32 (!%p105_p2), 1, %s372_s7  }
  0x22   : > { %108 = sbr.rel (%p105_p2) target bundleno = 55 (0x37), region = 24  ;;  %s232_s20 = sshll.u32 (!%p105_p2), %s478_s16, 3 }
  0x23   : > { %s111_s21 = scalar_lea.sflag (!%p105_p2), [#allocation3], %s478_s16  ;;  %s114_s22 = scalar_lea.vmem (!%p105_p2), [#allocation2], %s232_s20 }
  0x27   : > { %359 = dma.done.wait (%p435_p6), %s111_s21, 128  }
  0x28   : > { %361 = vsyncadd (%p435_p6), %s111_s21, 4294967168  ;;  %s235_s23 = sshll.u32 %s413_s10, 3  ;;  %v134_v0 = vld [vmem:[%s114_s22] sm:$0xff]  ;;  %s133_s27 = scalar_lea.vmem [#allocation5], %s232_s20 }
  0x29   : > { %v135_v1 = vmul.f32 127.5, %v134_v0  ;;  %s151_s26 = scalar_lea.hbm %s520_s1, %s235_s23  ;;  %s153_s28 = sshll.u32 %s133_s27, 4  ;;  %s154_s28 = int_to_ptr.vmem [resolvable:$true] %s153_s28 }
  0x2a   : > { %s155_s29 = sshll.u32 %s151_s26, 4  ;;  %s141_s17 = scalar_lea.sflag [#allocation4], %s478_s16  ;;  %s156_s29 = int_to_ptr.hbm [resolvable:$true] %s155_s29 }
  0x2b   : > { %v136_v2 = vadd.f32 128.0, %v135_v1  ;;  %s328_s30 = sshra.s32 %s156_s29, 4  ;;  %s334_s4 = scalar_lea.hbm %s520_s1, 16  ;;  %s329_s30 = int_to_ptr.hbm [resolvable:$true] %s328_s30 }
  0x2c   : > { %s330_s10 = scalar_lea.hbm %s329_s30, 8  ;;  %p335_p0 = scmp.lt.s32.totalorder %s329_s30, %s520_s1 }
  0x2d   : > { %v137_v3 = vmax.f32 %v136_v2, 0.0  ;;  %p331_p6 = scmp.ne.s32.totalorder %s329_s30, %s330_s10  ;;  %p336_p1 = scmp.lt.s32.totalorder %s334_s4, %s330_s10 }
  0x2f   : > { %v138_v4 = vmin.f32 %v137_v3, 255.0  ;;  %p332_p9 = pnand %p331_p6, %p442_p11  ;;  %p337_p3 = por %p336_p1, %p335_p0 }
  0x31   : > { %139 = vst [vmem:[%s133_s27] sm:$0xff] %v138_v4  ;;  %p333_p13 = pneg %p332_p9 }
  0x33   : > { %p338_p4 = pnand %p337_p3, %p333_p13 }
  0x35   : > { %341 = shalt.err (!%p338_p4)
}
  0x36   : > { %240 = dma.vmem_to_hbm [thread:$0]  (%p442_p11), %s154_s28, 128, %s156_s29, %s141_s17  }
  0x37 PF: > { %s167_s13 = sand.u32 1, %s368_s6   ;;  %p526_p7 = scmp.ge.s32.totalorder %s380_s9, 2 }
  0x38   : > { %s168_s14 = scalar_lea.sflag [#allocation4], %s167_s13 }
  0x39   : > { %p247_p5 = pnand %p526_p7, %p446_p12 }
  0x3b   : > { %p248_p8 = pneg %p247_p5 }
  0x3d   : > { %363 = dma.done.wait (%p248_p8), %s168_s14, 128  }
  0x3e   : > { %365 = vsyncadd (%p248_p8), %s168_s14, 4294967168  ;;  %p14_p10 = scmp.ge.s32.totalorder %s417_s12, 4   ;;  %s527_s6 = smov %s372_s7 }
  0x3f   : > { %s528_s7 = smov %s376_s8  ;;  %s529_s8 = smov %s429_s15 }
  0x40   : > { %s530_s9 = smov %s417_s12  ;;  %16 = sbr.rel (!%p14_p10) target bundleno = 5 (0x5), region = 69 }
  0x45   :  { %174 = vsyncpa [#allocation3], 1 }
  0x46   :  { %176 = vsyncpa [#allocation3 + $0x1], 1 }
  0x47   :  { %177 = vsyncpa [#allocation4], 1 }
  0x48   :  { %179 = vsyncpa [#allocation4 + $0x1], 1 }

</bundles_post_ra>
